<compile_context>
chip_gen: v7x
topology: tpu7x:2x2x1
jax: 0.10.0
libtpu: 0.0.40
codegen_flags: <defaults>
</compile_context>

<pallas_src>
import jax
import jax.numpy as jnp
from jax.experimental import pallas as pl
from jax.experimental.pallas import tpu as pltpu


A_HIDDEN = 20          # "a" in the original script
N = 30                 # "n" in the original script
ENC_DIM = 2            # encoder output width
DEC_DIM = N - 1        # 29 (ae == False)
OUT_W = 32             # [enc (2) | dec (29) | 1 zero pad lane] -> lane-dense output slab


def _round_up(v, m):
    return ((v + m - 1) // m) * m


def _pack_params(params, d):
    """Pack w1..w4 / b1..b4 into a single (d + 46, 32) f32 slab.

    Row layout (columns padded to OUT_W = 32):
      [0, d)          w1 (d, 20)    cols 0:20
      [d, d+20)       w2 (20, 2)    cols 0:2    -> enc lands in output lanes 0:2
      [d+20, d+22)    w3 (2, 20)    cols 0:20
      [d+22, d+42)    w4 (20, 29)   cols 2:31   -> dec lands in output lanes 2:31
      d+42 .. d+45    b1, b2, b3, b4 (one row each, same column layout as their weight)
    """
    rb = d + 2 * A_HIDDEN + ENC_DIM
    P = jnp.zeros((rb + 4, OUT_W), jnp.float32)
    P = P.at[0:d, 0:A_HIDDEN].set(params["w1"])
    P = P.at[d:d + A_HIDDEN, 0:ENC_DIM].set(params["w2"])
    P = P.at[d + A_HIDDEN:d + A_HIDDEN + ENC_DIM, 0:A_HIDDEN].set(params["w3"])
    P = P.at[d + A_HIDDEN + ENC_DIM:rb, ENC_DIM:ENC_DIM + DEC_DIM].set(params["w4"])
    P = P.at[rb + 0, 0:A_HIDDEN].set(params["b1"][0])
    P = P.at[rb + 1, 0:ENC_DIM].set(params["b2"][0])
    P = P.at[rb + 2, 0:A_HIDDEN].set(params["b3"][0])
    P = P.at[rb + 3, ENC_DIM:ENC_DIM + DEC_DIM].set(params["b4"][0])
    return P


def _make_kernel(d):
    r_w2 = d
    r_w3 = d + A_HIDDEN
    r_w4 = d + A_HIDDEN + ENC_DIM
    r_b = d + 2 * A_HIDDEN + ENC_DIM

    def kernel(x_ref, p_ref, out_ref):
        x = x_ref[...]                                        # (TB, D), f32 or bf16
        cdt = x.dtype

        # VMEM-resident packed weights/biases (f32 slab; weights cast to compute dtype).
        w1 = p_ref[0:d, 0:A_HIDDEN].astype(cdt)               # (D, 20)
        w2 = p_ref[r_w2:r_w2 + A_HIDDEN, :].astype(cdt)       # (20, 32)  enc -> lanes 0:2
        w3 = p_ref[r_w3:r_w3 + ENC_DIM, 0:A_HIDDEN]           # (2, 20)   f32
        w4 = p_ref[r_w4:r_w4 + A_HIDDEN, :].astype(cdt)       # (20, 32)  dec -> lanes 2:31
        b1 = p_ref[r_b + 0:r_b + 1, 0:A_HIDDEN]               # (1, 20)   f32
        b2 = p_ref[r_b + 1:r_b + 2, :]                        # (1, 32)   f32 (0 in 2:32)
        b3 = p_ref[r_b + 2:r_b + 3, 0:A_HIDDEN]               # (1, 20)   f32
        b4 = p_ref[r_b + 3:r_b + 4, :]                        # (1, 32)   f32 (0 in 0:2,31)

        # ---- encoder ----
        h1 = jnp.maximum(jnp.dot(x, w1, preferred_element_type=jnp.float32) + b1, 0.0)
        # Lane-dense "enc slab": enc in lanes 0:2, exact zeros elsewhere (zero-padded w2/b2).
        enc_slab = jnp.dot(h1.astype(cdt), w2, preferred_element_type=jnp.float32) + b2

        # ---- decoder ----
        # K=2 contraction: two broadcast FMAs on the VPU (an MXU matmul would waste a
        # full push/pop round-trip for a 2-deep contraction).
        h2 = enc_slab[:, 0:1] * w3[0:1, :] + enc_slab[:, 1:2] * w3[1:2, :] + b3
        h2 = jnp.maximum(h2, 0.0)
        # Lane-dense "dec slab": dec in lanes 2:31, exact zeros in lanes 0:2 and 31.
        dec_slab = jnp.dot(h2.astype(cdt), w4, preferred_element_type=jnp.float32) + b4

        # Single full-block store (no masked partial-lane vst, no explicit pad-lane fill).
        out_ref[...] = (enc_slab + dec_slab).astype(out_ref.dtype)

    return kernel


def mlp_forward(x, params, *, block_batch=8192, use_bf16=False, bf16_out=None,
                x_buffers=2):
    """Full forward pass in one pipelined Pallas kernel.

    Args:
      x: (B, D) float32.
      params: dict with w1..w4 (in, out) and b1..b4 (1, out), all float32.
      block_batch: requested batch tile (large; amortizes per-grid-step overhead).
      use_bf16: cast x (and weights, in-kernel) to bf16; accumulation/bias/ReLU stay f32.
                Safe & beneficial on v5e/v6e/v7x (MXU takes bf16 inputs).
      bf16_out: emit the output slab in bf16 (defaults to use_bf16) to halve writeback.
      x_buffers: input pipeline depth for x (2 = default double buffering; sweep 2 vs 3).
    Returns:
      (encoded (B, 2), decoded (B, n-1)).
    """
    B, D = x.shape
    if bf16_out is None:
        bf16_out = use_bf16
    out_dtype = jnp.bfloat16 if bf16_out else jnp.float32

    if use_bf16:
        x = x.astype(jnp.bfloat16)

    p_slab = _pack_params(params, D)

    # --- batch tile: as large as possible (amortize ~0.35 us / ~600 cyc per grid step),
    #     but keep >= 4 grid steps when the batch allows (v7x has 2 TensorCores; the
    #     "parallel" grid axis is what shards work across them).
    sub = 16 if use_bf16 else 8            # bf16 packs 16 rows per sublane group
    tb = _round_up(max(min(block_batch, B), sub), sub)
    if B > 4 * sub:
        tb = min(tb, _round_up(pl.cdiv(B, 4), sub))
    tb = max(tb, sub)

    # --- VMEM guard: double-buffered x + out tiles plus the weight slab must fit well
    #     under v7x's 64 MiB physical VMEM (v5e/v6e have 128 MiB).
    x_item = jnp.dtype(x.dtype).itemsize
    out_item = jnp.dtype(out_dtype).itemsize

    def vmem_needed(t):
        return (2 * t * (D * x_item + OUT_W * out_item)
                + 2 * p_slab.size * 4 + (1 << 20))            # +1 MiB slack

    while vmem_needed(tb) > (40 << 20) and tb > sub:
        tb = max(sub, _round_up(tb // 2, sub))

    b_pad = _round_up(B, tb)
    if b_pad != B:
        x = jnp.pad(x, ((0, b_pad - B), (0, 0)))

    flops = 2 * b_pad * (D * A_HIDDEN + 2 * A_HIDDEN * OUT_W + 2 * ENC_DIM * A_HIDDEN)
    bytes_accessed = (x.size * x_item + p_slab.size * 4 + b_pad * OUT_W * out_item)
    cost = pl.CostEstimate(flops=flops, transcendentals=0, bytes_accessed=bytes_accessed)

    x_spec_kwargs = {}
    if x_buffers != 2:                     # optionally deepen the x input pipeline
        x_spec_kwargs["pipeline_mode"] = pl.Buffered(x_buffers)

    out = pl.pallas_call(
        _make_kernel(D),
        out_shape=jax.ShapeDtypeStruct((b_pad, OUT_W), out_dtype),
        grid=(b_pad // tb,),
        in_specs=[
            pl.BlockSpec((tb, D), lambda i: (i, 0), **x_spec_kwargs),
            pl.BlockSpec(p_slab.shape, lambda i: (0, 0)),     # VMEM-resident weight slab
        ],
        out_specs=pl.BlockSpec((tb, OUT_W), lambda i: (i, 0)),
        compiler_params=pltpu.CompilerParams(
            dimension_semantics=("parallel",),
            vmem_limit_bytes=int(min(max(vmem_needed(tb), 32 << 20), 48 << 20)),
        ),
        cost_estimate=cost,
    )(x, p_slab)

    enc = out[:B, :ENC_DIM]
    dec = out[:B, ENC_DIM:ENC_DIM + DEC_DIM]
    return enc, dec


def init_params(key, in_features):
    """Deterministic PyTorch-Linear-style init: uniform(-1/sqrt(fan_in), +1/sqrt(fan_in))."""
    dims = [
        (in_features, A_HIDDEN),   # encoder Linear 1
        (A_HIDDEN, ENC_DIM),       # encoder Linear 2
        (ENC_DIM, A_HIDDEN),       # decoder Linear 1
        (A_HIDDEN, DEC_DIM),       # decoder Linear 2 (ae == False)
    ]
    params = {}
    for i, (fan_in, fan_out) in enumerate(dims, start=1):
        key, kw, kb = jax.random.split(key, 3)
        bound = 1.0 / jnp.sqrt(float(fan_in))
        params[f"w{i}"] = jax.random.uniform(
            kw, (fan_in, fan_out), jnp.float32, minval=-bound, maxval=bound)
        params[f"b{i}"] = jax.random.uniform(
            kb, (1, fan_out), jnp.float32, minval=-bound, maxval=bound)
    return params


def reference_forward(x, p):
    h1 = jnp.maximum(x @ p["w1"] + p["b1"], 0.0)
    enc = h1 @ p["w2"] + p["b2"]
    h2 = jnp.maximum(enc @ p["w3"] + p["b3"], 0.0)
    dec = h2 @ p["w4"] + p["b4"]
    return enc, dec


if __name__ == "__main__":
    key = jax.random.PRNGKey(0)
    key, kx, kp = jax.random.split(key, 3)

    # Small demo shapes (exercises tail padding 50 -> 64 rows and a 4-step grid).
    B, D = 50, 16
    x = jax.random.normal(kx, (B, D), dtype=jnp.float32)
    params = init_params(kp, D)
    enc_ref, dec_ref = reference_forward(x, params)

    # f32 path (default large-tile heuristics; tile is auto-capped for the tiny batch).
    enc, dec = mlp_forward(x, params)
    enc, dec = jax.block_until_ready((enc, dec))
    assert enc.shape == (B, ENC_DIM) and dec.shape == (B, DEC_DIM)
    assert jnp.allclose(enc, enc_ref, atol=1e-4, rtol=1e-4)
    assert jnp.allclose(dec, dec_ref, atol=1e-4, rtol=1e-4)

    # bf16 activations/weights + bf16 output slab (memory-bound path), f32 accumulation.
    enc16, dec16 = mlp_forward(x, params, use_bf16=True)
    enc16, dec16 = jax.block_until_ready((enc16, dec16))
    assert jnp.allclose(enc16.astype(jnp.float32), enc_ref, atol=1e-1, rtol=1e-1)
    assert jnp.allclose(dec16.astype(jnp.float32), dec_ref, atol=1e-1, rtol=1e-1)

    print("KERNEL_OK")
</pallas_src>

<mosaic_0001>
module attributes {stable_mosaic.version = 11 : i64} {
  func.func @kernel(%arg0: i32, %arg1: memref<16x16xf32, #tpu.memory_space<vmem>>, %arg2: memref<62x32xf32, #tpu.memory_space<vmem>>, %arg3: memref<16x32xf32, #tpu.memory_space<vmem>>) attributes {dimension_semantics = [#tpu.dimension_semantics<parallel>], iteration_bounds = array<i64: 4>, scalar_prefetch = 0 : i64, scratch_operands = 0 : i64, tpu.core_type = #tpu.core_type<tc>, window_params = [{transform_indices = @transform_0, window_bounds = array<i64: 16, 16>}, {pipeline_mode = #tpu.pipeline_mode<synchronous>, transform_indices = @transform_1, window_bounds = array<i64: 62, 32>}, {transform_indices = @transform_2, window_bounds = array<i64: 16, 32>}]} {
    %c0 = arith.constant 0 : index
    %c0_0 = arith.constant 0 : index
    %0 = vector.load %arg1[%c0, %c0_0] : memref<16x16xf32, #tpu.memory_space<vmem>>, vector<16x16xf32>
    %c0_1 = arith.constant 0 : index
    %c0_2 = arith.constant 0 : index
    %1 = vector.load %arg2[%c0_1, %c0_2] : memref<62x32xf32, #tpu.memory_space<vmem>>, vector<16x20xf32>
    %c16 = arith.constant 16 : index
    %c0_3 = arith.constant 0 : index
    %2 = vector.load %arg2[%c16, %c0_3] : memref<62x32xf32, #tpu.memory_space<vmem>>, vector<20x32xf32>
    %c36 = arith.constant 36 : index
    %c0_4 = arith.constant 0 : index
    %3 = vector.load %arg2[%c36, %c0_4] : memref<62x32xf32, #tpu.memory_space<vmem>>, vector<2x20xf32>
    %c38 = arith.constant 38 : index
    %c0_5 = arith.constant 0 : index
    %4 = vector.load %arg2[%c38, %c0_5] : memref<62x32xf32, #tpu.memory_space<vmem>>, vector<20x32xf32>
    %c58 = arith.constant 58 : index
    %c0_6 = arith.constant 0 : index
    %5 = vector.load %arg2[%c58, %c0_6] : memref<62x32xf32, #tpu.memory_space<vmem>>, vector<1x20xf32>
    %c59 = arith.constant 59 : index
    %c0_7 = arith.constant 0 : index
    %6 = vector.load %arg2[%c59, %c0_7] : memref<62x32xf32, #tpu.memory_space<vmem>>, vector<1x32xf32>
    %c60 = arith.constant 60 : index
    %c0_8 = arith.constant 0 : index
    %7 = vector.load %arg2[%c60, %c0_8] : memref<62x32xf32, #tpu.memory_space<vmem>>, vector<1x20xf32>
    %c61 = arith.constant 61 : index
    %c0_9 = arith.constant 0 : index
    %8 = vector.load %arg2[%c61, %c0_9] : memref<62x32xf32, #tpu.memory_space<vmem>>, vector<1x32xf32>
    %cst = arith.constant dense<0.000000e+00> : vector<16x20xf32>
    %9 = tpu.matmul %0, %1, %cst {dimension_numbers = #tpu.dot_dimension_numbers<[1], [0], [0], [1], [0, 0, 1, 1], [], []>} : vector<16x16xf32>, vector<16x20xf32>, vector<16x20xf32> -> vector<16x20xf32>
    %10 = vector.broadcast %5 : vector<1x20xf32> to vector<16x20xf32>
    %11 = arith.addf %9, %10 : vector<16x20xf32>
    %cst_10 = arith.constant 0.000000e+00 : f32
    %12 = vector.broadcast %cst_10 : f32 to vector<16x20xf32>
    %13 = arith.maximumf %11, %12 : vector<16x20xf32>
    %cst_11 = arith.constant dense<0.000000e+00> : vector<16x32xf32>
    %14 = tpu.matmul %13, %2, %cst_11 {dimension_numbers = #tpu.dot_dimension_numbers<[1], [0], [0], [1], [0, 0, 1, 1], [], []>} : vector<16x20xf32>, vector<20x32xf32>, vector<16x32xf32> -> vector<16x32xf32>
    %15 = vector.broadcast %6 : vector<1x32xf32> to vector<16x32xf32>
    %16 = arith.addf %14, %15 : vector<16x32xf32>
    %17 = vector.extract_strided_slice %16 {offsets = [0, 0], sizes = [16, 1], strides = [1, 1]} : vector<16x32xf32> to vector<16x1xf32>
    %18 = vector.extract_strided_slice %3 {offsets = [0, 0], sizes = [1, 20], strides = [1, 1]} : vector<2x20xf32> to vector<1x20xf32>
    %19 = vector.broadcast %17 : vector<16x1xf32> to vector<16x20xf32>
    %20 = vector.broadcast %18 : vector<1x20xf32> to vector<16x20xf32>
    %21 = arith.mulf %19, %20 : vector<16x20xf32>
    %22 = vector.extract_strided_slice %16 {offsets = [0, 1], sizes = [16, 1], strides = [1, 1]} : vector<16x32xf32> to vector<16x1xf32>
    %23 = vector.extract_strided_slice %3 {offsets = [1, 0], sizes = [1, 20], strides = [1, 1]} : vector<2x20xf32> to vector<1x20xf32>
    %24 = vector.broadcast %22 : vector<16x1xf32> to vector<16x20xf32>
    %25 = vector.broadcast %23 : vector<1x20xf32> to vector<16x20xf32>
    %26 = arith.mulf %24, %25 : vector<16x20xf32>
    %27 = arith.addf %21, %26 : vector<16x20xf32>
    %28 = vector.broadcast %7 : vector<1x20xf32> to vector<16x20xf32>
    %29 = arith.addf %27, %28 : vector<16x20xf32>
    %cst_12 = arith.constant 0.000000e+00 : f32
    %30 = vector.broadcast %cst_12 : f32 to vector<16x20xf32>
    %31 = arith.maximumf %29, %30 : vector<16x20xf32>
    %cst_13 = arith.constant dense<0.000000e+00> : vector<16x32xf32>
    %32 = tpu.matmul %31, %4, %cst_13 {dimension_numbers = #tpu.dot_dimension_numbers<[1], [0], [0], [1], [0, 0, 1, 1], [], []>} : vector<16x20xf32>, vector<20x32xf32>, vector<16x32xf32> -> vector<16x32xf32>
    %33 = vector.broadcast %8 : vector<1x32xf32> to vector<16x32xf32>
    %34 = arith.addf %32, %33 : vector<16x32xf32>
    %35 = arith.addf %16, %34 : vector<16x32xf32>
    %c0_14 = arith.constant 0 : index
    %c0_15 = arith.constant 0 : index
    %36 = vector.load %arg3[%c0_14, %c0_15] : memref<16x32xf32, #tpu.memory_space<vmem>>, vector<16x32xf32>
    tpu.vector_store %arg3[%c0_14, %c0_15], %35 {strides = array<i32>} : memref<16x32xf32, #tpu.memory_space<vmem>>, vector<16x32xf32>,
    return
  }
  func.func @transform_0(%arg0: i32) -> (i32, i32) {
    %c0_i32 = arith.constant 0 : i32
    %c0_i32_0 = arith.constant 0 : i32
    return %arg0, %c0_i32 : i32, i32
  }
  func.func @transform_1(%arg0: i32) -> (i32, i32) {
    %c0_i32 = arith.constant 0 : i32
    %c0_i32_0 = arith.constant 0 : i32
    %c0_i32_1 = arith.constant 0 : i32
    return %c0_i32, %c0_i32_0 : i32, i32
  }
  func.func @transform_2(%arg0: i32) -> (i32, i32) {
    %c0_i32 = arith.constant 0 : i32
    %c0_i32_0 = arith.constant 0 : i32
    return %arg0, %c0_i32 : i32, i32
  }
}

</mosaic_0001>

<bundles_post_ra>
// kernel: tpu_custom_call.1
= control target key start
LH: loop header
LB: loop body
LE: loop exit
PB: predicated region body
PF: predicated region fallthrough
CT: control target
= control target key end

     0   :  { %s642_s9 = smov 0   ;;  %s713_s0 = inlined_call_operand.vmem [shape: f32[64,16], index: 0, kind: input, shape index: {}]   ;;  %s714_s1 = inlined_call_operand.vmem [shape: f32[62,32], index: 1, kind: input, shape index: {}]   ;;  %s715_s2 = inlined_call_operand.vmem [shape: f32[64,32], index: 2, kind: output, shape index: {}]  }
   0x1 LB: > { %s529_s10 = sadd.s32 4294967295, %s623_s9   ;;  %p533_p0 = scmp.ge.s32.totalorder %s623_s9, 1  ;;  %s623_s9 = sphi %s642_s9, %s12_s9  }
   0x2   : > { %p113_p1 = scmp.lt.s32.totalorder %s623_s9, 5 }
   0x4   : > { %p114_p2 = pnand %p533_p0, %p113_p1 }
   0x5   : > { %v149_v0 = vld [vmem:[%s714_s1] sm:$0xff] (!%p114_p2)  ;;  %v150_v1 = vld [vmem:[%s714_s1 + $0x8] sm:$0xff] (!%p114_p2)  ;;  %s534_s15 = sshll.u32 (!%p114_p2), %s529_s10, 1  ;;  %vm166_vm0 = vcmask (!%p114_p2), 130048   ;;  %v151_v5 = vld [vmem:[%s714_s1 + $0x10] sm:$0xff] (!%p114_p2)  ;;  %vm261_vm1 = vcmask (!%p114_p2), 1043456   ;;  %v350_v27 = vlaneseq (!%p114_p2) }
   0x6   : > { %117 = sbr.rel (%p114_p2) target bundleno = 811 (0x32b), region = 28  ;;  %v591_v2 = vpack.c.bf16 (!%p114_p2), %v150_v1, %v149_v0  ;;  %p136_p3 = scmp.lt.s32.totalorder (!%p114_p2), %s534_s15, 7  ;;  %v152_v6 = vld [vmem:[%s714_s1 + $0x18] sm:$0xff] (!%p114_p2)  ;;  %v153_v8 = vld [vmem:[%s714_s1 + $0x20] sm:$0xf] (!%p114_p2)  ;;  %vm254_vm2 = vcmask (!%p114_p2), 162816  }
   0x7   : > { %v595_v7 = vpack.c.bf16 (!%p114_p2), %v152_v6, %v151_v5  ;;  %v538_v9 = vld [vmem:[%s714_s1 + $0x3a] ss:$0 sm:$0xff] (!%p114_p2)  ;;  %v625_v16 = vmov (!%p114_p2), 0   ;;  %v541_v17 = vld [vmem:[%s714_s1 + $0x3b] ss:$0 sm:$0xff] (!%p114_p2)  ;;  %v626_v22 = vmov (!%p114_p2), 1  }
   0x8   : > { %592 = vmatprep.subr.bf16.mxu0 (!%p114_p2), %v591_v2  ;;  %615 = vset.pattern.permute.xlu1 (!%p114_p2), %v625_v16  ;;  %v155_v23 = vld [vmem:[%s714_s1 + $0x26] sm:$0xff] (!%p114_p2)  ;;  %v156_v24 = vld [vmem:[%s714_s1 + $0x2e] sm:$0xff] (!%p114_p2)  ;;  %v157_v26 = vld [vmem:[%s714_s1 + $0x36] sm:$0xf] (!%p114_p2)  ;;  %v351_v28 = vshrl.u32 (!%p114_p2), %v350_v27, 7  ;;  %vm470_vm3 = vcmask (!%p114_p2), 261120  }
   0x9   : > { %594 = vmatpush3.bf16.msra.mxu0 (!%p114_p2), %v591_v2  ;;  %596 = vmatprep.subr.bf16.mxu1 (!%p114_p2), %v595_v7  ;;  %v599_v25 = vpack.c.bf16 (!%p114_p2), %v156_v24, %v155_v23  ;;  %v154_v31 = vld [vmem:[%s714_s1 + $0x24] sm:$0x3] (!%p114_p2)  ;;  %v545_v41 = vld [vmem:[%s714_s1 + $0x3c] ss:$0 sm:$0xff] (!%p114_p2)  ;;  %v546_v49 = vld [vmem:[%s714_s1 + $0x3d] ss:$0 sm:$0xff] (!%p114_p2) }
   0xa   : > { %598 = vmatpush3.bf16.msra.mxu1 (!%p114_p2), %v595_v7  ;;  %613 = vset.pattern.permute.xlu0 (!%p114_p2), %v625_v16  ;;  %v352_v29 = vsub.s32 (!%p114_p2), 0, %v351_v28  ;;  %v366_v30 = vsub.s32 (!%p114_p2), 1, %v351_v28 }
   0xb   : > { %577 = vmatprep.subr.msk.mxu1 (!%p114_p2), %vm261_vm1, %v153_v8  ;;  %600 = vmatprep.subr.bf16.mxu0 (!%p114_p2), %v599_v25 }
   0xc   : > { %v353_v34 = vrot.slane (!%p114_p2), %v154_v31, %v352_v29  ;;  %v367_v35 = vrot.slane (!%p114_p2), %v154_v31, %v366_v30 }
   0xd   : > { %s717_s15 = smov (!%p136_p3, %s534_s15), 7 }
   0xe   : > { %s535_s16 = sshll.u32 %s717_s15, 3  ;;  %578 = vmatpush3.msk.msra.mxu1 %vm261_vm1, %v153_v8 }
   0xf   : > { %s139_s19 = scalar_lea.vmem %s713_s0, %s535_s16 }
  0x10   : > { %v147_v3 = vld [vmem:[%s139_s19] sm:$0xff]  ;;  %v148_v4 = vld [vmem:[%s139_s19 + $0x8] sm:$0xff]  ;;  %s145_s19 = scalar_lea.vmem %s715_s2, %s535_s16 }
  0x11   : > { %570 = vmatprep.mubr.msk.f32.mxu0 %vm166_vm0, %v147_v3 }
  0x12   : > { %571 = vmatmul.mubr.msk.f32.vlgmr.msra.gmra.mrb[0].mxu0 %vm166_vm0, %v148_v4 }
  0x13   : > { %602 = vmatpush3.bf16.msra.mxu0 %v599_v25 }
  0x14   : > { %586 = vmatprep.subr.msk.mxu0 %vm261_vm1, %v157_v26 }
  0x17   : > { %587 = vmatpush3.msk.msra.mxu0 %vm261_vm1, %v157_v26 }
  0xe5   : > { %v572_v10 = vpop.f32.mrb[0].mxu0 }
  0xe6   : > { %v245_v11 = vadd.f32 %v572_v10, %v538_v9  ;;  %v239_v12 = vpop.f32.mrb[1].mxu0 }
  0xe7   : > { %v240_v13 = vadd.f32 %v538_v9, %v239_v12 }
  0xe8   : > { %v249_v15 = vmax.f32 %v245_v11, 0.0 }
  0xe9   : > { %v248_v14 = vmax.f32 %v240_v13, 0.0 }
  0xeb   : > { %579 = vmatprep.mubr.msk.f32.mxu1 %vm254_vm2, %v248_v14 }
  0xec   : > { %580 = vmatmul.mubr.msk.f32.vlgmr.msra.gmra.mrb[0].mxu1 %vm254_vm2, %v249_v15 }
 0x1bf   : > { %v581_v18 = vpop.f32.mrb[0].mxu1 }
 0x1c0   : > { %v337_v19 = vadd.f32 %v581_v18, %v541_v17  ;;  %v331_v20 = vpop.f32.mrb[1].mxu1 }
 0x1c1   : > { %v332_v21 = vadd.f32 %v541_v17, %v331_v20 }
 0x1c2   : > { %347 = vperm.xlu1 %615, %v337_v19  }
 0x1c3   : > { %342 = vperm.xlu0 %613, %v332_v21  }
 0x1c6   : > { %616 = vset.pattern.permute.xlu1 %v626_v22 }
 0x1c7   : > { %361 = vperm.xlu1 %616, %v337_v19   ;;  %614 = vset.pattern.permute.xlu0 %v626_v22 }
 0x1c8   : > { %357 = vperm.xlu0 %614, %v332_v21  }
 0x241   : > { %v348_v32 = vpop.permute.xlu1 %347 }
 0x242   : > { %v343_v33 = vpop.permute.xlu0 %342  ;;  %v355_v37 = vmul.f32 %v353_v34, %v348_v32 }
 0x243   : > { %v354_v40 = vmul.f32 %v353_v34, %v343_v33 }
 0x246   : > { %v362_v36 = vpop.permute.xlu1 %361 }
 0x247   : > { %v369_v38 = vmul.f32 %v367_v35, %v362_v36  ;;  %v358_v39 = vpop.permute.xlu0 %357 }
 0x248   : > { %v368_v42 = vmul.f32 %v367_v35, %v358_v39 }
 0x249   : > { %v371_v43 = vadd.f32 %v369_v38, %v355_v37 }
 0x24a   : > { %v370_v44 = vadd.f32 %v368_v42, %v354_v40 }
 0x24b   : > { %v377_v45 = vadd.f32 %v545_v41, %v371_v43 }
 0x24c   : > { %v376_v46 = vadd.f32 %v545_v41, %v370_v44 }
 0x24d   : > { %v379_v48 = vmax.f32 %v377_v45, 0.0 }
 0x24e   : > { %v378_v47 = vmax.f32 %v376_v46, 0.0 }
 0x250   : > { %588 = vmatprep.mubr.msk.f32.mxu0 %vm254_vm2, %v378_v47 }
 0x251   : > { %589 = vmatmul.mubr.msk.f32.vlgmr.msra.gmra.mrb[2].mxu0 %vm254_vm2, %v379_v48 }
 0x324   : > { %v590_v50 = vpop.f32.mrb[2].mxu0 }
 0x325   : > { %v465_v51 = vadd.f32 %v590_v50, %v546_v49  ;;  %v459_v52 = vpop.f32.mrb[3].mxu0 }
 0x326   : > { %v460_v53 = vadd.f32 %v546_v49, %v459_v52 }
 0x327   : > { %v469_v55 = vadd.f32 %v465_v51, %v337_v19 }
 0x328   : > { %v468_v54 = vadd.f32 %v460_v53, %v332_v21 }
 0x329   : > { %472 = vst.msk [vmem:[%s145_s19 + $0x8] sm:$0xff] %vm470_vm3, %v469_v55 }
 0x32a   : > { %471 = vst.msk [vmem:[%s145_s19] sm:$0xff] %vm470_vm3, %v468_v54 }
 0x32b PF: > { %s12_s9 = sadd.s32 1, %s623_s9  }
 0x32c   : > { %p9_p4 = scmp.ge.s32.totalorder %s12_s9, 6  }
 0x32e   :  { %11 = sbr.rel (!%p9_p4) target bundleno = 1 (0x1), region = 58 }

</bundles_post_ra>
